<compile_context>
chip_gen: v6e
topology: v6e:2x2x1
jax: 0.10.0
libtpu: 0.0.40
codegen_flags: <defaults>
</compile_context>

<pallas_src>
import functools

import jax
import jax.numpy as jnp
import numpy as np
from jax.experimental import pallas as pl
from jax.experimental.pallas import tpu as pltpu

_MIB = 1024 * 1024


def _leaky_relu(x, slope=0.01):
    # nn.LeakyReLU() default negative_slope = 0.01
    return jnp.where(x >= 0, x, slope * x)


def _agg_kernel(*refs, agg_type, tm, tk, full_e):
    """Grid = (row tiles of A/out, reduction tiles over A columns / E rows)."""
    out_ref, side_acc = refs[-2], refs[-1]
    a_ref, e_red_ref, e_ego_ref = refs[0], refs[1], refs[2]
    wrefs = refs[3:-2]

    # Grid queries hoisted to the top level of the kernel body (pl.program_id
    # inside a pl.when branch does not lower on the interpret path).
    k = pl.program_id(1)
    nk = pl.num_programs(1)
    if full_e:
        ks = pl.multiple_of(k * tk, tk)

    @pl.when(k == 0)
    def _():
        side_acc[...] = jnp.zeros_like(side_acc)

    # side_embeddings accumulation: A[rows, k-tile] @ E[k-tile, :]
    if full_e:
        e_k = e_red_ref[pl.ds(ks, tk), :]        # slice of the resident E
    else:
        e_k = e_red_ref[...]                     # streamed (tk, D) tile
    side_acc[...] += jnp.dot(a_ref[...], e_k, preferred_element_type=jnp.float32)

    @pl.when(k == nk - 1)
    def _():
        ego = e_ego_ref[...].astype(jnp.float32)
        side = side_acc[...]

        if agg_type == 'gcn':
            w_ref, b_ref = wrefs
            z = jnp.dot(ego + side, w_ref[...],
                        preferred_element_type=jnp.float32) + b_ref[...]
            out = _leaky_relu(z)
        elif agg_type == 'graphsage':
            # cat([ego, side], dim=1) @ Wt == ego @ Wt[:D] + side @ Wt[D:]
            # (W pre-split on the host -> no in-kernel ref slicing.)
            w_ego_ref, w_side_ref, b_ref = wrefs
            z = (jnp.dot(ego, w_ego_ref[...], preferred_element_type=jnp.float32)
                 + jnp.dot(side, w_side_ref[...], preferred_element_type=jnp.float32)
                 + b_ref[...])
            out = _leaky_relu(z)
        elif agg_type == 'bi':
            w1_ref, b1_ref, w2_ref, b2_ref = wrefs
            z1 = jnp.dot(ego + side, w1_ref[...],
                         preferred_element_type=jnp.float32) + b1_ref[...]
            z2 = jnp.dot(ego * side, w2_ref[...],
                         preferred_element_type=jnp.float32) + b2_ref[...]
            out = _leaky_relu(z1) + _leaky_relu(z2)
        else:
            raise NotImplementedError(agg_type)
        out_ref[...] = out.astype(out_ref.dtype)


def _divisors(n):
    ds = set()
    d = 1
    while d * d <= n:
        if n % d == 0:
            ds.add(d)
            ds.add(n // d)
        d += 1
    return sorted(ds)


def _vmem_estimate(N, D, Do, tm, tk, a_sz, e_sz, o_sz, w_bytes, full_e):
    est = 2 * tm * tk * a_sz                       # A tile, double-buffered
    if full_e:
        est += 2 * N * D * e_sz                    # resident E (budget 2 buffers)
    else:
        est += 2 * tk * D * e_sz                   # streamed reduction tile of E
    est += 2 * tm * D * e_sz                       # ego rows, double-buffered
    est += 2 * tm * Do * o_sz                      # output tile, double-buffered
    est += tm * D * 4                              # f32 accumulator scratch
    est += 2 * w_bytes                             # weights / biases
    return est


def _choose_tiles(N, D, Do, a_sz, e_sz, o_sz, w_bytes, full_e,
                  tm_cap, tk_cap, vmem_budget):
    divs = _divisors(N)
    tk_opts = [d for d in divs if d <= tk_cap and (d % 128 == 0 or d == N)] or [N]
    tm_opts = [d for d in divs if d <= tm_cap and (d % 8 == 0 or d == N)] or [N]
    # v7x megacore: keep >= 2 row tiles so "parallel" can shard across the 2 TCs.
    mc = [d for d in tm_opts if N // d >= 2]
    if mc:
        tm_opts = mc

    best = None
    for tmo in tm_opts:
        for tko in tk_opts:
            est = _vmem_estimate(N, D, Do, tmo, tko, a_sz, e_sz, o_sz, w_bytes, full_e)
            if est > vmem_budget:
                continue
            key = (tmo * tko, tko, tmo)
            if best is None or key > best[0]:
                best = (key, tmo, tko, est)
    if best is None:
        tmo, tko = min(tm_opts), min(tk_opts)
        est = _vmem_estimate(N, D, Do, tmo, tko, a_sz, e_sz, o_sz, w_bytes, full_e)
        return tmo, tko, est
    return best[1], best[2], best[3]


def aggregator_forward(norm_matrix, ego_embeddings, params, agg_type, *,
                       tm=None, tk=None, compute_dtype=None,
                       tm_cap=512, tk_cap=2048,
                       full_e_budget=8 * _MIB, vmem_budget=48 * _MIB):
    """Fused (A @ E) + Linear(s) + LeakyReLU for the KGAT Aggregator."""
    N, D = ego_embeddings.shape
    w, b = params['w'], params['b']          # w: (in, out), b: (1, out)
    Do = w.shape[1]

    a = norm_matrix
    e = ego_embeddings
    if compute_dtype is not None:            # e.g. bf16 on v6e/v7x: halves A stream
        a = a.astype(compute_dtype)
        e = e.astype(compute_dtype)

    # Weight operands (small, constant index maps -> fetched once, stay resident).
    if agg_type == 'gcn':
        weight_arrays = (w, b)
    elif agg_type == 'graphsage':
        weight_arrays = (w[:D, :], w[D:, :], b)     # pre-split on host
    elif agg_type == 'bi':
        weight_arrays = (w, b, params['w2'], params['b2'])
    else:
        raise NotImplementedError(agg_type)

    a_sz = jnp.dtype(a.dtype).itemsize
    e_sz = jnp.dtype(e.dtype).itemsize
    o_sz = jnp.dtype(ego_embeddings.dtype).itemsize
    w_bytes = sum(int(np.prod(x.shape)) * jnp.dtype(x.dtype).itemsize
                  for x in weight_arrays)

    # Keep the whole E resident in VMEM when it is small.
    full_e = (N * D * e_sz) <= full_e_budget

    if tm is None or tk is None:
        tm, tk, est = _choose_tiles(N, D, Do, a_sz, e_sz, o_sz, w_bytes, full_e,
                                    tm_cap, tk_cap, vmem_budget)
    else:
        assert N % tm == 0 and N % tk == 0
        est = _vmem_estimate(N, D, Do, tm, tk, a_sz, e_sz, o_sz, w_bytes, full_e)

    vmem_limit = int(min(max(est * 1.5, 32 * _MIB), 64 * _MIB))

    grid = (N // tm, N // tk)
    a_spec = pl.BlockSpec((tm, tk), lambda i, k: (i, k))
    if full_e:
        # Resident full E for the reduction (sliced in-kernel with pl.ds).
        e_red_spec = pl.BlockSpec((N, D), lambda i, k: (0, 0))
    else:
        # Streamed (tk, D) reduction tile of E.
        e_red_spec = pl.BlockSpec((tk, D), lambda i, k: (k, 0))
    # Ego rows: keyed only on the row-tile index -> fetched once per row tile.
    e_ego_spec = pl.BlockSpec((tm, D), lambda i, k: (i, 0))
    weight_specs = [pl.BlockSpec(x.shape, lambda i, k: (0, 0)) for x in weight_arrays]

    kernel = functools.partial(_agg_kernel, agg_type=agg_type,
                               tm=tm, tk=tk, full_e=full_e)

    # TODO(synk): exploit block-level sparsity of A (scalar-prefetched nonzero
    # block list to skip all-zero A tiles) for large, genuinely sparse graphs.
    out = pl.pallas_call(
        kernel,
        out_shape=jax.ShapeDtypeStruct((N, Do), ego_embeddings.dtype),
        grid_spec=pltpu.PrefetchScalarGridSpec(
            num_scalar_prefetch=0,
            grid=grid,
            in_specs=[a_spec, e_red_spec, e_ego_spec, *weight_specs],
            out_specs=pl.BlockSpec((tm, Do), lambda i, k: (i, 0)),
            scratch_shapes=[pltpu.VMEM((tm, D), jnp.float32)],
        ),
        compiler_params=pltpu.CompilerParams(
            dimension_semantics=("parallel", "arbitrary"),
            vmem_limit_bytes=vmem_limit),
    )(a, e, e, *weight_arrays)

    # message_dropout: identity in eval mode.
    # TODO(synk): training-mode dropout (pltpu PRNG Bernoulli mask) not implemented.
    return out


def _init_linear(key, fan_in, fan_out):
    """Deterministic PyTorch-Linear-like uniform init; returns (W^T, b_row)."""
    kw, kb = jax.random.split(key)
    bound = 1.0 / np.sqrt(fan_in)
    wt = jax.random.uniform(kw, (fan_in, fan_out), jnp.float32, -bound, bound)
    b = jax.random.uniform(kb, (1, fan_out), jnp.float32, -bound, bound)
    return wt, b


def _reference(norm_matrix, ego, params, agg_type):
    side = norm_matrix @ ego
    w, b = params['w'], params['b']
    if agg_type == 'gcn':
        return _leaky_relu((ego + side) @ w + b)
    if agg_type == 'graphsage':
        return _leaky_relu(jnp.concatenate([ego, side], axis=1) @ w + b)
    if agg_type == 'bi':
        return (_leaky_relu((ego + side) @ w + b)
                + _leaky_relu((ego * side) @ params['w2'] + params['b2']))
    raise NotImplementedError(agg_type)


if __name__ == "__main__":
    key = jax.random.PRNGKey(0)
    k_a, k_e, k_w1, k_w2, k_w3, k_w4 = jax.random.split(key, 6)

    N = 256           # number of graph nodes
    D = 32            # input_dim
    Do = 32           # output_dim

    # "Sparse" normalized adjacency built as a dense matrix (sparse mm -> dense mm).
    mask = (jax.random.uniform(k_a, (N, N)) < 0.05).astype(jnp.float32)
    vals = jax.random.uniform(k_a, (N, N), jnp.float32)
    norm_matrix = mask * vals / 16.0
    ego = jax.random.normal(k_e, (N, D), jnp.float32)

    # Parameters for each aggregator type.
    w_gcn, b_gcn = _init_linear(k_w1, D, Do)
    w_sage, b_sage = _init_linear(k_w2, 2 * D, Do)
    w1_bi, b1_bi = _init_linear(k_w3, D, Do)
    w2_bi, b2_bi = _init_linear(k_w4, D, Do)

    configs = {
        'gcn': {'w': w_gcn, 'b': b_gcn},
        'graphsage': {'w': w_sage, 'b': b_sage},
        'bi': {'w': w1_bi, 'b': b1_bi, 'w2': w2_bi, 'b2': b2_bi},
    }

    # Exact (f32) path.
    for agg_type, params in configs.items():
        out = aggregator_forward(norm_matrix, ego, params, agg_type)
        out = jax.block_until_ready(out)
        ref = _reference(norm_matrix, ego, params, agg_type)
        np.testing.assert_allclose(np.asarray(out), np.asarray(ref),
                                   rtol=1e-5, atol=1e-5)

    # bf16 A/E streaming path (v6e/v7x bandwidth optimization), loose tolerance.
    out_bf16 = aggregator_forward(norm_matrix, ego, configs['bi'], 'bi',
                                  compute_dtype=jnp.bfloat16)
    out_bf16 = jax.block_until_ready(out_bf16)
    ref_bi = _reference(norm_matrix, ego, configs['bi'], 'bi')
    np.testing.assert_allclose(np.asarray(out_bf16), np.asarray(ref_bi),
                               rtol=1e-1, atol=1e-1)

    print("KERNEL_OK")
</pallas_src>

<mosaic_0001>
module attributes {stable_mosaic.version = 11 : i64} {
  func.func @_agg_kernel(%arg0: i32, %arg1: i32, %arg2: memref<128x256xf32, #tpu.memory_space<vmem>>, %arg3: memref<256x32xf32, #tpu.memory_space<vmem>>, %arg4: memref<128x32xf32, #tpu.memory_space<vmem>>, %arg5: memref<32x32xf32, #tpu.memory_space<vmem>>, %arg6: memref<1x32xf32, #tpu.memory_space<vmem>>, %arg7: memref<128x32xf32, #tpu.memory_space<vmem>>, %arg8: memref<128x32xf32, #tpu.memory_space<vmem>>) attributes {dimension_semantics = [#tpu.dimension_semantics<parallel>, #tpu.dimension_semantics<arbitrary>], iteration_bounds = array<i64: 2, 1>, scalar_prefetch = 0 : i64, scratch_operands = 1 : i64, tpu.core_type = #tpu.core_type<tc>, window_params = [{transform_indices = @transform_0, window_bounds = array<i64: 128, 256>}, {pipeline_mode = #tpu.pipeline_mode<synchronous>, transform_indices = @transform_1, window_bounds = array<i64: 256, 32>}, {transform_indices = @transform_2, window_bounds = array<i64: 128, 32>}, {pipeline_mode = #tpu.pipeline_mode<synchronous>, transform_indices = @transform_3, window_bounds = array<i64: 32, 32>}, {pipeline_mode = #tpu.pipeline_mode<synchronous>, transform_indices = @transform_4, window_bounds = array<i64: 1, 32>}, {transform_indices = @transform_5, window_bounds = array<i64: 128, 32>}]} {
    %c256_i32 = arith.constant 256 : i32
    %0 = arith.muli %arg1, %c256_i32 : i32
    %1 = tpu.assume_multiple %0, 256 : i32
    %c0_i32 = arith.constant 0 : i32
    %2 = arith.cmpi eq, %arg1, %c0_i32 : i32
    %3 = arith.extui %2 : i1 to i32
    %c0_i32_0 = arith.constant 0 : i32
    %4 = arith.cmpi ne, %3, %c0_i32_0 : i32
    scf.if %4 {
      %cst_9 = arith.constant 0.000000e+00 : f32
      %15 = vector.broadcast %cst_9 : f32 to vector<128x32xf32>
      %c0_10 = arith.constant 0 : index
      %c0_11 = arith.constant 0 : index
      %16 = vector.load %arg8[%c0_10, %c0_11] : memref<128x32xf32, #tpu.memory_space<vmem>>, vector<128x32xf32>
      tpu.vector_store %arg8[%c0_10, %c0_11], %15 {strides = array<i32>} : memref<128x32xf32, #tpu.memory_space<vmem>>, vector<128x32xf32>,
    } else {
    }
    %5 = arith.index_cast %1 : i32 to index
    %c0 = arith.constant 0 : index
    %6 = vector.load %arg3[%5, %c0] : memref<256x32xf32, #tpu.memory_space<vmem>>, vector<256x32xf32>
    %c0_1 = arith.constant 0 : index
    %c0_2 = arith.constant 0 : index
    %7 = vector.load %arg8[%c0_1, %c0_2] : memref<128x32xf32, #tpu.memory_space<vmem>>, vector<128x32xf32>
    %c0_3 = arith.constant 0 : index
    %c0_4 = arith.constant 0 : index
    %8 = vector.load %arg2[%c0_3, %c0_4] : memref<128x256xf32, #tpu.memory_space<vmem>>, vector<128x256xf32>
    %cst = arith.constant dense<0.000000e+00> : vector<128x32xf32>
    %9 = tpu.matmul %8, %6, %cst {dimension_numbers = #tpu.dot_dimension_numbers<[1], [0], [0], [1], [0, 0, 1, 1], [], []>} : vector<128x256xf32>, vector<256x32xf32>, vector<128x32xf32> -> vector<128x32xf32>
    %10 = arith.addf %7, %9 : vector<128x32xf32>
    %c0_5 = arith.constant 0 : index
    %c0_6 = arith.constant 0 : index
    %11 = vector.load %arg8[%c0_5, %c0_6] : memref<128x32xf32, #tpu.memory_space<vmem>>, vector<128x32xf32>
    tpu.vector_store %arg8[%c0_5, %c0_6], %10 {strides = array<i32>} : memref<128x32xf32, #tpu.memory_space<vmem>>, vector<128x32xf32>,
    %c0_i32_7 = arith.constant 0 : i32
    %12 = arith.cmpi eq, %arg1, %c0_i32_7 : i32
    %13 = arith.extui %12 : i1 to i32
    %c0_i32_8 = arith.constant 0 : i32
    %14 = arith.cmpi ne, %13, %c0_i32_8 : i32
    scf.if %14 {
      %c0_9 = arith.constant 0 : index
      %c0_10 = arith.constant 0 : index
      %15 = vector.load %arg4[%c0_9, %c0_10] : memref<128x32xf32, #tpu.memory_space<vmem>>, vector<128x32xf32>
      %c0_11 = arith.constant 0 : index
      %c0_12 = arith.constant 0 : index
      %16 = vector.load %arg8[%c0_11, %c0_12] : memref<128x32xf32, #tpu.memory_space<vmem>>, vector<128x32xf32>
      %17 = arith.addf %15, %16 : vector<128x32xf32>
      %c0_13 = arith.constant 0 : index
      %c0_14 = arith.constant 0 : index
      %18 = vector.load %arg5[%c0_13, %c0_14] : memref<32x32xf32, #tpu.memory_space<vmem>>, vector<32x32xf32>
      %cst_15 = arith.constant dense<0.000000e+00> : vector<128x32xf32>
      %19 = tpu.matmul %17, %18, %cst_15 {dimension_numbers = #tpu.dot_dimension_numbers<[1], [0], [0], [1], [0, 0, 1, 1], [], []>} : vector<128x32xf32>, vector<32x32xf32>, vector<128x32xf32> -> vector<128x32xf32>
      %c0_16 = arith.constant 0 : index
      %c0_17 = arith.constant 0 : index
      %20 = vector.load %arg6[%c0_16, %c0_17] : memref<1x32xf32, #tpu.memory_space<vmem>>, vector<1x32xf32>
      %21 = vector.broadcast %20 : vector<1x32xf32> to vector<128x32xf32>
      %22 = arith.addf %19, %21 : vector<128x32xf32>
      %cst_18 = arith.constant 0.000000e+00 : f32
      %23 = vector.broadcast %cst_18 : f32 to vector<128x32xf32>
      %24 = arith.cmpf oge, %22, %23 : vector<128x32xf32>
      %cst_19 = arith.constant 0.00999999977 : f32
      %25 = vector.broadcast %cst_19 : f32 to vector<128x32xf32>
      %26 = arith.mulf %25, %22 : vector<128x32xf32>
      %27 = arith.select %24, %22, %26 : vector<128x32xi1>, vector<128x32xf32>
      %c0_20 = arith.constant 0 : index
      %c0_21 = arith.constant 0 : index
      %28 = vector.load %arg7[%c0_20, %c0_21] : memref<128x32xf32, #tpu.memory_space<vmem>>, vector<128x32xf32>
      tpu.vector_store %arg7[%c0_20, %c0_21], %27 {strides = array<i32>} : memref<128x32xf32, #tpu.memory_space<vmem>>, vector<128x32xf32>,
    } else {
    }
    return
  }
  func.func @transform_0(%arg0: i32, %arg1: i32) -> (i32, i32) {
    %c0_i32 = arith.constant 0 : i32
    return %arg0, %arg1 : i32, i32
  }
  func.func @transform_1(%arg0: i32, %arg1: i32) -> (i32, i32) {
    %c0_i32 = arith.constant 0 : i32
    %c0_i32_0 = arith.constant 0 : i32
    %c0_i32_1 = arith.constant 0 : i32
    return %c0_i32, %c0_i32_0 : i32, i32
  }
  func.func @transform_2(%arg0: i32, %arg1: i32) -> (i32, i32) {
    %c0_i32 = arith.constant 0 : i32
    %c0_i32_0 = arith.constant 0 : i32
    return %arg0, %c0_i32 : i32, i32
  }
  func.func @transform_3(%arg0: i32, %arg1: i32) -> (i32, i32) {
    %c0_i32 = arith.constant 0 : i32
    %c0_i32_0 = arith.constant 0 : i32
    %c0_i32_1 = arith.constant 0 : i32
    return %c0_i32, %c0_i32_0 : i32, i32
  }
  func.func @transform_4(%arg0: i32, %arg1: i32) -> (i32, i32) {
    %c0_i32 = arith.constant 0 : i32
    %c0_i32_0 = arith.constant 0 : i32
    %c0_i32_1 = arith.constant 0 : i32
    return %c0_i32, %c0_i32_0 : i32, i32
  }
  func.func @transform_5(%arg0: i32, %arg1: i32) -> (i32, i32) {
    %c0_i32 = arith.constant 0 : i32
    %c0_i32_0 = arith.constant 0 : i32
    return %arg0, %c0_i32 : i32, i32
  }
}

</mosaic_0001>

<bundles_post_ra>
// kernel: tpu_custom_call.1
= control target key start
LH: loop header
LB: loop body
LE: loop exit
PB: predicated region body
PF: predicated region fallthrough
CT: control target
= control target key end

     0   :  { %s1242_s18 = smov 0   ;;  %s1244_s19 = smov 0   ;;  %s1549_s0 = inlined_call_operand.vmem [shape: f32[256,256], index: 0, kind: input, shape index: {}]   ;;  %s1550_s1 = inlined_call_operand.vmem [shape: f32[256,32], index: 1, kind: input, shape index: {}]   ;;  %s1551_s2 = inlined_call_operand.vmem [shape: f32[256,32], index: 2, kind: input, shape index: {}]   ;;  %s1552_s3 = inlined_call_operand.vmem [shape: f32[32,32], index: 3, kind: input, shape index: {}]   ;;  %s1553_s4 = inlined_call_operand.vmem [shape: f32[1,32], index: 4, kind: input, shape index: {}]   ;;  %s1554_s5 = inlined_call_operand.vmem [shape: f32[256,32], index: 5, kind: output, shape index: {}]  }
   0x1   :  { %s1246_s20 = smov 0  }
   0x2 LB: > { %s27_s21 = sadd.s32 1, %s1205_s19  ;;  %p970_p0 = scmp.ge.s32.totalorder %s1209_s20, 1  ;;  %s1209_s20 = sphi %s1246_s20, %s15_s20   ;;  %s1205_s19 = sphi %s1244_s19, %s1556_s19   ;;  %s1201_s18 = sphi %s1242_s18, %s1555_s18  }
   0x3   : > { %p29_p1 = scmp.ge.s32.totalorder %s27_s21, 2  ;;  %p219_p2 = scmp.lt.s32.totalorder %s1209_s20, 3 }
   0x5   : > { %s1558_s21 = smov (%p29_p1, %s27_s21), 0  ;;  %p220_p3 = pnand %p970_p0, %p219_p2 }
   0x6   : > { %s971_s28 = sshll.u32 (!%p220_p3), %s1201_s18, 4 }
   0x7   : > { %223 = sbr.rel (%p220_p3) target bundleno = 507 (0x1fb), region = 40  ;;  %p259_p4 = scmp.lt.s32.totalorder (!%p220_p3), %s971_s28, 31 }
   0xc   : > { %v335_v0 = vld [vmem:[%s1550_s1 + $0xf8] sm:$0xff]  ;;  %v334_v2 = vld [vmem:[%s1550_s1 + $0xf0] sm:$0xff]  ;;  %v333_v4 = vld [vmem:[%s1550_s1 + $0xe8] sm:$0xff]  ;;  %s1560_s28 = smov (!%p259_p4, %s971_s28), 31  ;;  %vm286_vm0 = vcmask 261120  }
   0xd   : > { %v319_v1 = vld [vmem:[%s1550_s1 + $0x78] sm:$0xff]  ;;  %998 = vmatprep.subr.mxu0 %v335_v0  ;;  %v318_v3 = vld [vmem:[%s1550_s1 + $0x70] sm:$0xff]  ;;  %1130 = vmatprep.subr.mxu1 %v335_v0  ;;  %v317_v5 = vld [vmem:[%s1550_s1 + $0x68] sm:$0xff]  ;;  %s997_s14 = sshll.u32 %s1560_s28, 4  ;;  %v1211_v0 = vmov 0.0   ;;  %s975_s12 = sshll.u32 %s1560_s28, 3 }
   0xe   : > { %999 = vmatpush3.msra.mxu0 %v319_v1  ;;  %1146 = vmatpush3.msra.mxu1 %v319_v1  ;;  %v332_v6 = vld [vmem:[%s1550_s1 + $0xe0] sm:$0xff]  ;;  %v331_v8 = vld [vmem:[%s1550_s1 + $0xd8] sm:$0xff]  ;;  %s1296_s24 = scalar_lea.vmem %s1549_s0, %s997_s14  ;;  %v330_v10 = vld [vmem:[%s1550_s1 + $0xd0] sm:$0xff]  ;;  %287 = vst.msk [vmem:[#allocation2] sm:$0xff] %vm286_vm0, %v1211_v0  ;;  %s1431_s15 = scalar_lea.vmem %s1551_s2, %s975_s12 }
   0xf   : > { %1000 = vmatprep.subr.mxu0 %v334_v2  ;;  %1131 = vmatprep.subr.mxu1 %v334_v2  ;;  %v316_v7 = vld [vmem:[%s1550_s1 + $0x60] sm:$0xff]  ;;  %v315_v9 = vld [vmem:[%s1550_s1 + $0x58] sm:$0xff]  ;;  %v314_v11 = vld [vmem:[%s1550_s1 + $0x50] sm:$0xff]  ;;  %288 = vst.msk [vmem:[#allocation2 + $0x8] sm:$0xff] %vm286_vm0, %v1211_v0  ;;  %s1491_s23 = scalar_lea.vmem %s1554_s5, %s975_s12 }
  0x10   : > { %1001 = vmatpush3.msra.mxu0 %v318_v3  ;;  %1147 = vmatpush3.msra.mxu1 %v318_v3  ;;  %v329_v12 = vld [vmem:[%s1550_s1 + $0xc8] sm:$0xff]  ;;  %v328_v15 = vld [vmem:[%s1550_s1 + $0xc0] sm:$0xff]  ;;  %v327_v17 = vld [vmem:[%s1550_s1 + $0xb8] sm:$0xff]  ;;  %289 = vst.msk [vmem:[#allocation2 + $0x10] sm:$0xff] %vm286_vm0, %v1211_v0 }
  0x11   : > { %1002 = vmatprep.subr.mxu0 %v333_v4  ;;  %1132 = vmatprep.subr.mxu1 %v333_v4  ;;  %v353_v13 = vld [vmem:[%s1296_s24 + $0x8] sm:$0xff]  ;;  %v312_v16 = vld [vmem:[%s1550_s1 + $0x40] sm:$0xff]  ;;  %v311_v18 = vld [vmem:[%s1550_s1 + $0x38] sm:$0xff]  ;;  %290 = vst.msk [vmem:[#allocation2 + $0x18] sm:$0xff] %vm286_vm0, %v1211_v0 }
  0x12   : > { %1003 = vmatpush3.msra.mxu0 %v317_v5  ;;  %1148 = vmatpush3.msra.mxu1 %v317_v5  ;;  %v313_v14 = vld [vmem:[%s1550_s1 + $0x48] sm:$0xff]  ;;  %v326_v19 = vld [vmem:[%s1550_s1 + $0xb0] sm:$0xff]  ;;  %v324_v23 = vld [vmem:[%s1550_s1 + $0xa0] sm:$0xff]  ;;  %291 = vst.msk [vmem:[#allocation2 + $0x20] sm:$0xff] %vm286_vm0, %v1211_v0 }
  0x13   : > { %1004 = vmatprep.subr.mxu0 %v332_v6  ;;  %1133 = vmatprep.subr.mxu1 %v332_v6  ;;  %v310_v20 = vld [vmem:[%s1550_s1 + $0x30] sm:$0xff]  ;;  %v325_v21 = vld [vmem:[%s1550_s1 + $0xa8] sm:$0xff]  ;;  %v308_v24 = vld [vmem:[%s1550_s1 + $0x20] sm:$0xff]  ;;  %292 = vst.msk [vmem:[#allocation2 + $0x28] sm:$0xff] %vm286_vm0, %v1211_v0 }
  0x14   : > { %1005 = vmatpush3.msra.mxu0 %v316_v7  ;;  %1149 = vmatpush3.msra.mxu1 %v316_v7  ;;  %v309_v22 = vld [vmem:[%s1550_s1 + $0x28] sm:$0xff]  ;;  %v323_v25 = vld [vmem:[%s1550_s1 + $0x98] sm:$0xff]  ;;  %v322_v27 = vld [vmem:[%s1550_s1 + $0x90] sm:$0xff]  ;;  %293 = vst.msk [vmem:[#allocation2 + $0x30] sm:$0xff] %vm286_vm0, %v1211_v0 }
  0x15   : > { %1006 = vmatprep.subr.mxu0 %v331_v8  ;;  %1134 = vmatprep.subr.mxu1 %v331_v8  ;;  %v307_v26 = vld [vmem:[%s1550_s1 + $0x18] sm:$0xff]  ;;  %v306_v28 = vld [vmem:[%s1550_s1 + $0x10] sm:$0xff]  ;;  %v321_v29 = vld [vmem:[%s1550_s1 + $0x88] sm:$0xff]  ;;  %294 = vst.msk [vmem:[#allocation2 + $0x38] sm:$0xff] %vm286_vm0, %v1211_v0 }
  0x16   : > { %1007 = vmatpush3.msra.mxu0 %v315_v9  ;;  %1150 = vmatpush3.msra.mxu1 %v315_v9  ;;  %v305_v30 = vld [vmem:[%s1550_s1 + $0x8] sm:$0xff]  ;;  %v320_v31 = vld [vmem:[%s1550_s1 + $0x80] sm:$0xff]  ;;  %v355_v34 = vld [vmem:[%s1296_s24 + $0x18] sm:$0xff]  ;;  %295 = vst.msk [vmem:[#allocation2 + $0x40] sm:$0xff] %vm286_vm0, %v1211_v0 }
  0x17   : > { %1008 = vmatprep.subr.mxu0 %v330_v10  ;;  %448 = vmatprep.mubr.f32.mxu0 %v353_v13  ;;  %v304_v32 = vld [vmem:[%s1550_s1] sm:$0xff]  ;;  %v377_v35 = vld [vmem:[%s1296_s24 + $0xc8] sm:$0xff]  ;;  %v379_v37 = vld [vmem:[%s1296_s24 + $0xd8] sm:$0xff]  ;;  %296 = vst.msk [vmem:[#allocation2 + $0x48] sm:$0xff] %vm286_vm0, %v1211_v0 }
  0x18   : > { %1009 = vmatpush3.msra.mxu0 %v314_v11  ;;  %1135 = vmatprep.subr.mxu1 %v330_v10  ;;  %v352_v33 = vld [vmem:[%s1296_s24] sm:$0xff]  ;;  %v354_v38 = vld [vmem:[%s1296_s24 + $0x10] sm:$0xff]  ;;  %v357_v39 = vld [vmem:[%s1296_s24 + $0x28] sm:$0xff]  ;;  %297 = vst.msk [vmem:[#allocation2 + $0x50] sm:$0xff] %vm286_vm0, %v1211_v0 }
  0x19   : > { %1010 = vmatprep.subr.mxu0 %v329_v12  ;;  %1151 = vmatpush3.msra.mxu1 %v314_v11  ;;  %v376_v36 = vld [vmem:[%s1296_s24 + $0xc0] sm:$0xff]  ;;  %v378_v40 = vld [vmem:[%s1296_s24 + $0xd0] sm:$0xff]  ;;  %v381_v41 = vld [vmem:[%s1296_s24 + $0xe8] sm:$0xff]  ;;  %298 = vst.msk [vmem:[#allocation2 + $0x58] sm:$0xff] %vm286_vm0, %v1211_v0 }
  0x1a   : > { %1011 = vmatpush3.msra.mxu0 %v313_v14  ;;  %1136 = vmatprep.subr.mxu1 %v329_v12  ;;  %v356_v42 = vld [vmem:[%s1296_s24 + $0x20] sm:$0xff]  ;;  %v359_v43 = vld [vmem:[%s1296_s24 + $0x38] sm:$0xff]  ;;  %v358_v46 = vld [vmem:[%s1296_s24 + $0x30] sm:$0xff]  ;;  %299 = vst.msk [vmem:[#allocation2 + $0x60] sm:$0xff] %vm286_vm0, %v1211_v0 }
  0x1b   : > { %1012 = vmatprep.subr.mxu0 %v328_v15  ;;  %1152 = vmatpush3.msra.mxu1 %v313_v14  ;;  %v380_v44 = vld [vmem:[%s1296_s24 + $0xe0] sm:$0xff]  ;;  %v383_v45 = vld [vmem:[%s1296_s24 + $0xf8] sm:$0xff]  ;;  %v361_v47 = vld [vmem:[%s1296_s24 + $0x48] sm:$0xff]  ;;  %300 = vst.msk [vmem:[#allocation2 + $0x68] sm:$0xff] %vm286_vm0, %v1211_v0 }
  0x1c   : > { %1013 = vmatpush3.msra.mxu0 %v312_v16  ;;  %1137 = vmatprep.subr.mxu1 %v328_v15  ;;  %v382_v48 = vld [vmem:[%s1296_s24 + $0xf0] sm:$0xff]  ;;  %v360_v49 = vld [vmem:[%s1296_s24 + $0x40] sm:$0xff]  ;;  %v363_v50 = vld [vmem:[%s1296_s24 + $0x58] sm:$0xff]  ;;  %301 = vst.msk [vmem:[#allocation2 + $0x70] sm:$0xff] %vm286_vm0, %v1211_v0 }
  0x1d   : > { %1014 = vmatprep.subr.mxu0 %v327_v17  ;;  %1153 = vmatpush3.msra.mxu1 %v312_v16  ;;  %v362_v51 = vld [vmem:[%s1296_s24 + $0x50] sm:$0xff]  ;;  %v365_v52 = vld [vmem:[%s1296_s24 + $0x68] sm:$0xff]  ;;  %v364_v53 = vld [vmem:[%s1296_s24 + $0x60] sm:$0xff]  ;;  %302 = vst.msk [vmem:[#allocation2 + $0x78] sm:$0xff] %vm286_vm0, %v1211_v0 }
  0x1e   : > { %1015 = vmatpush3.msra.mxu0 %v311_v18  ;;  %1138 = vmatprep.subr.mxu1 %v327_v17  ;;  %v367_v54 = vld [vmem:[%s1296_s24 + $0x78] sm:$0xff]  ;;  %v366_v55 = vld [vmem:[%s1296_s24 + $0x70] sm:$0xff]  ;;  %v369_v56 = vld [vmem:[%s1296_s24 + $0x88] sm:$0xff] }
  0x1f   : > { %1016 = vmatprep.subr.mxu0 %v326_v19  ;;  %1154 = vmatpush3.msra.mxu1 %v311_v18  ;;  %v368_v57 = vld [vmem:[%s1296_s24 + $0x80] sm:$0xff]  ;;  %v371_v58 = vld [vmem:[%s1296_s24 + $0x98] sm:$0xff]  ;;  %v370_v59 = vld [vmem:[%s1296_s24 + $0x90] sm:$0xff] }
  0x20   : > { %1017 = vmatpush3.msra.mxu0 %v310_v20  ;;  %1139 = vmatprep.subr.mxu1 %v326_v19  ;;  %v373_v60 = vld [vmem:[%s1296_s24 + $0xa8] sm:$0xff]  ;;  %v372_v61 = vld [vmem:[%s1296_s24 + $0xa0] sm:$0xff]  ;;  %v375_v62 = vld [vmem:[%s1296_s24 + $0xb8] sm:$0xff] }
  0x21   : > { %1018 = vmatprep.subr.mxu0 %v325_v21  ;;  %1155 = vmatpush3.msra.mxu1 %v310_v20  ;;  %v374_v63 = vld [vmem:[%s1296_s24 + $0xb0] sm:$0xff]  ;;  %v616_v1 = vld [vmem:[%s1552_s3 + $0x18] sm:$0xff]  ;;  %v614_v3 = vld [vmem:[%s1552_s3 + $0x8] sm:$0xff] }
  0x22   : > { %1019 = vmatpush3.msra.mxu0 %v309_v22  ;;  %1140 = vmatprep.subr.mxu1 %v325_v21  ;;  %v615_v2 = vld [vmem:[%s1552_s3 + $0x10] sm:$0xff]  ;;  %v613_v4 = vld [vmem:[%s1552_s3] sm:$0xff]  ;;  %v337_v15 = vld [vmem:[#allocation2 + $0x8] sm:$0xff] }
  0x23   : > { %1020 = vmatprep.subr.mxu0 %v324_v23  ;;  %1156 = vmatpush3.msra.mxu1 %v309_v22  ;;  %v336_v6 = vld [vmem:[#allocation2] sm:$0xff]  ;;  %v349_v21 = vld [vmem:[#allocation2 + $0x68] sm:$0xff]  ;;  %v568_v0 = vld [vmem:[%s1431_s15 + $0x18] sm:$0xff] }
  0x24   : > { %1021 = vmatpush3.msra.mxu0 %v308_v24  ;;  %1141 = vmatprep.subr.mxu1 %v324_v23  ;;  %v348_v11 = vld [vmem:[#allocation2 + $0x60] sm:$0xff] }
  0x25   : > { %1022 = vmatprep.subr.mxu0 %v323_v25  ;;  %1157 = vmatpush3.msra.mxu1 %v308_v24 }
  0x26   : > { %1023 = vmatpush3.msra.mxu0 %v307_v26  ;;  %1142 = vmatprep.subr.mxu1 %v323_v25  ;;  %v338_v25 = vld [vmem:[#allocation2 + $0x10] sm:$0xff] }
  0x27   : > { %1024 = vmatprep.subr.mxu0 %v322_v27  ;;  %1158 = vmatpush3.msra.mxu1 %v307_v26 }
  0x28   : > { %1025 = vmatpush3.msra.mxu0 %v306_v28  ;;  %1143 = vmatprep.subr.mxu1 %v322_v27 }
  0x29   : > { %1026 = vmatprep.subr.mxu0 %v321_v29  ;;  %1159 = vmatpush3.msra.mxu1 %v306_v28 }
  0x2a   : > { %1027 = vmatpush3.msra.mxu0 %v305_v30  ;;  %1144 = vmatprep.subr.mxu1 %v321_v29 }
  0x2b   : > { %1028 = vmatprep.subr.mxu0 %v320_v31  ;;  %1160 = vmatpush3.msra.mxu1 %v305_v30 }
  0x2c   : > { %1029 = vmatpush3.msra.mxu0 %v304_v32  ;;  %1145 = vmatprep.subr.mxu1 %v320_v31  ;;  %v565_v31 = vld [vmem:[%s1431_s15] sm:$0xff] }
  0x2d   : > { %449 = vmatmul.mubr.f32.vlgmr.msra.gmra.mxu0 %v352_v33  ;;  %1161 = vmatpush3.msra.mxu1 %v304_v32  ;;  %v350_v32 = vld [vmem:[#allocation2 + $0x70] sm:$0xff] }
  0x2e   : > { %453 = vmatprep.mubr.f32.mxu0 %v355_v34  ;;  %508 = vmatprep.mubr.f32.mxu1 %v377_v35 }
  0x2f   : > { %509 = vmatmul.mubr.f32.vlgmr.msra.gmra.mxu1 %v376_v36  ;;  %1098 = vmatprep.subr.mxu1 %v616_v1  ;;  %v339_v36 = vld [vmem:[#allocation2 + $0x18] sm:$0xff] }
  0x30   : > { %513 = vmatprep.mubr.f32.mxu1 %v379_v37  ;;  %1099 = vmatpush3.msra.mxu1 %v616_v1 }
  0x31   : > { %454 = vmatmul.mubr.f32.gmra.mxu0 %v354_v38  ;;  %1100 = vmatprep.subr.mxu1 %v615_v2 }
  0x32   : > { %458 = vmatprep.mubr.f32.mxu0 %v357_v39  ;;  %1101 = vmatpush3.msra.mxu1 %v615_v2  ;;  %v342_v2 = vld [vmem:[#allocation2 + $0x30] sm:$0xff] }
  0x33   : > { %514 = vmatmul.mubr.f32.gmra.mxu1 %v378_v40  ;;  %1102 = vmatprep.subr.mxu1 %v614_v3 }
  0x34   : > { %518 = vmatprep.mubr.f32.mxu1 %v381_v41  ;;  %1103 = vmatpush3.msra.mxu1 %v614_v3 }
  0x35   : > { %459 = vmatmul.mubr.f32.gmra.mxu0 %v356_v42  ;;  %1104 = vmatprep.subr.mxu1 %v613_v4 }
  0x36   : > { %463 = vmatprep.mubr.f32.mxu0 %v359_v43  ;;  %1105 = vmatpush3.msra.mxu1 %v613_v4 }
  0x37   : > { %519 = vmatmul.mubr.f32.gmra.mxu1 %v380_v44  ;;  %v566_v44 = vld [vmem:[%s1431_s15 + $0x8] sm:$0xff] }
  0x38   : > { %523 = vmatprep.mubr.f32.mxu1 %v383_v45  ;;  %v351_v45 = vld [vmem:[#allocation2 + $0x78] sm:$0xff] }
  0x39   : > { %464 = vmatmul.mubr.f32.gmra.mxu0 %v358_v46 }
  0x3a   : > { %468 = vmatprep.mubr.f32.mxu0 %v361_v47 }
  0x3b   : > { %524 = vmatmul.mubr.f32.gmra.mxu1 %v382_v48 }
  0x3d   : > { %469 = vmatmul.mubr.f32.gmra.mxu0 %v360_v49  ;;  %v340_v49 = vld [vmem:[#allocation2 + $0x20] sm:$0xff] }
  0x3e   : > { %473 = vmatprep.mubr.f32.mxu0 %v363_v50 }
  0x41   : > { %474 = vmatmul.mubr.f32.gmra.mxu0 %v362_v51 }
  0x42   : > { %478 = vmatprep.mubr.f32.mxu0 %v365_v52 }
  0x45   : > { %479 = vmatmul.mubr.f32.gmra.mxu0 %v364_v53 }
  0x46   : > { %483 = vmatprep.mubr.f32.mxu0 %v367_v54 }
  0x49   : > { %484 = vmatmul.mubr.f32.gmra.mxu0 %v366_v55 }
  0x4a   : > { %488 = vmatprep.mubr.f32.mxu0 %v369_v56  ;;  %v567_v56 = vld [vmem:[%s1431_s15 + $0x10] sm:$0xff] }
  0x4d   : > { %489 = vmatmul.mubr.f32.gmra.mxu0 %v368_v57 }
  0x4e   : > { %493 = vmatprep.mubr.f32.mxu0 %v371_v58  ;;  %v341_v58 = vld [vmem:[#allocation2 + $0x28] sm:$0xff] }
  0x51   : > { %494 = vmatmul.mubr.f32.gmra.mxu0 %v370_v59 }
  0x52   : > { %498 = vmatprep.mubr.f32.mxu0 %v373_v60 }
  0x55   : > { %499 = vmatmul.mubr.f32.gmra.mxu0 %v372_v61 }
  0x56   : > { %503 = vmatprep.mubr.f32.mxu0 %v375_v62 }
  0x59   : > { %504 = vmatmul.mubr.f32.gmra.mxu0 %v374_v63 }
  0xed   : > { %v1030_v5 = vpop.f32.mrf.mxu0 }
  0xef   : > { %v1031_v7 = vpop.f32.mrf.mxu0  ;;  %v1066_v8 = vpop.f32.mrf.mxu1 }
  0xf0   : > { %v1032_v9 = vadd.f32 %v1031_v7, %v1030_v5 }
  0xf1   : > { %v1033_v10 = vpop.f32.mrf.mxu0  ;;  %v1067_v12 = vpop.f32.mrf.mxu1 }
  0xf2   : > { %v529_v13 = vadd.f32 %v1032_v9, %v336_v6  ;;  %v1068_v14 = vadd.f32 %v1067_v12, %v1066_v8  ;;  %v569_v8 = vld [vmem:[%s1431_s15 + $0x20] sm:$0xff] }
  0xf3   : > { %v1034_v16 = vpop.f32.mrf.mxu0  ;;  %v1069_v17 = vpop.f32.mrf.mxu1 }
  0xf4   : > { %546 = vst.msk [vmem:[#allocation2] sm:$0xff] %vm286_vm0, %v529_v13  ;;  %v1035_v18 = vadd.f32 %v1034_v16, %v1033_v10  ;;  %v541_v19 = vadd.f32 %v1068_v14, %v348_v11  ;;  %v343_v10 = vld [vmem:[#allocation2 + $0x38] sm:$0xff]  ;;  %v570_v16 = vld [vmem:[%s1431_s15 + $0x28] sm:$0xff] }
  0xf5   : > { %v1036_v20 = vpop.f32.mrf.mxu0  ;;  %v1070_v22 = vpop.f32.mrf.mxu1 }
  0xf6   : > { %v530_v23 = vadd.f32 %v1035_v18, %v337_v15  ;;  %558 = vst.msk [vmem:[#allocation2 + $0x60] sm:$0xff] %vm286_vm0, %v541_v19  ;;  %v1071_v24 = vadd.f32 %v1070_v22, %v1069_v17  ;;  %v344_v18 = vld [vmem:[#allocation2 + $0x40] sm:$0xff] }
  0xf7   : > { %v1037_v26 = vpop.f32.mrf.mxu0  ;;  %v1072_v27 = vpop.f32.mrf.mxu1 }
  0xf8   : > { %547 = vst.msk [vmem:[#allocation2 + $0x8] sm:$0xff] %vm286_vm0, %v530_v23  ;;  %v1038_v28 = vadd.f32 %v1037_v26, %v1036_v20  ;;  %v542_v29 = vadd.f32 %v1071_v24, %v349_v21  ;;  %v571_v24 = vld [vmem:[%s1431_s15 + $0x30] sm:$0xff]  ;;  %v345_v26 = vld [vmem:[#allocation2 + $0x48] sm:$0xff] }
  0xf9   : > { %v1039_v30 = vpop.f32.mrf.mxu0  ;;  %v1073_v33 = vpop.f32.mrf.mxu1 }
  0xfa   : > { %v531_v34 = vadd.f32 %v1038_v28, %v338_v25  ;;  %559 = vst.msk [vmem:[#allocation2 + $0x68] sm:$0xff] %vm286_vm0, %v542_v29  ;;  %v1074_v35 = vadd.f32 %v1073_v33, %v1072_v27 }
  0xfb   : > { %v1040_v37 = vpop.f32.mrf.mxu0  ;;  %v581_v38 = vld [vmem:[#allocation2] sm:$0xff]  ;;  %v1075_v39 = vpop.f32.mrf.mxu1 }
  0xfc   : > { %548 = vst.msk [vmem:[#allocation2 + $0x10] sm:$0xff] %vm286_vm0, %v531_v34  ;;  %v1041_v40 = vadd.f32 %v1040_v37, %v1039_v30  ;;  %v597_v41 = vadd.f32 %v581_v38, %v565_v31  ;;  %v543_v42 = vadd.f32 %v1074_v35, %v350_v32  ;;  %v572_v32 = vld [vmem:[%s1431_s15 + $0x38] sm:$0xff]  ;;  %v346_v34 = vld [vmem:[#allocation2 + $0x50] sm:$0xff] }
  0xfd   : > { %v1042_v43 = vpop.f32.mrf.mxu0  ;;  %v1076_v46 = vpop.f32.mrf.mxu1 }
  0xfe   : > { %v532_v47 = vadd.f32 %v1041_v40, %v339_v36  ;;  %1106 = vmatprep.mubr.msk.f32.mxu1 %vm286_vm0, %v597_v41  ;;  %560 = vst.msk [vmem:[#allocation2 + $0x70] sm:$0xff] %vm286_vm0, %v543_v42  ;;  %v1077_v48 = vadd.f32 %v1076_v46, %v1075_v39  ;;  %v573_v40 = vld [vmem:[%s1431_s15 + $0x40] sm:$0xff]  ;;  %v347_v42 = vld [vmem:[#allocation2 + $0x58] sm:$0xff] }
  0xff   : > { %v1043_v50 = vpop.f32.mrf.mxu0  ;;  %v582_v51 = vld [vmem:[#allocation2 + $0x8] sm:$0xff] }
 0x100   : > { %549 = vst.msk [vmem:[#allocation2 + $0x18] sm:$0xff] %vm286_vm0, %v532_v47  ;;  %v1044_v52 = vadd.f32 %v1043_v50, %v1042_v43  ;;  %v598_v53 = vadd.f32 %v582_v51, %v566_v44  ;;  %v544_v54 = vadd.f32 %v1077_v48, %v351_v45  ;;  %v574_v47 = vld [vmem:[%s1431_s15 + $0x48] sm:$0xff]  ;;  %v575_v51 = vld [vmem:[%s1431_s15 + $0x50] sm:$0xff] }
 0x101   : > { %v1045_v55 = vpop.f32.mrf.mxu0 }
 0x102   : > { %v533_v57 = vadd.f32 %v1044_v52, %v340_v49  ;;  %1107 = vmatmul.mubr.msk.f32.vlgmr.msra.gmra.mxu1 %vm286_vm0, %v598_v53  ;;  %561 = vst.msk [vmem:[#allocation2 + $0x78] sm:$0xff] %vm286_vm0, %v544_v54  ;;  %v576_v54 = vld [vmem:[%s1431_s15 + $0x58] sm:$0xff] }
 0x103   : > { %v1046_v59 = vpop.f32.mrf.mxu0  ;;  %v583_v60 = vld [vmem:[#allocation2 + $0x10] sm:$0xff] }
 0x104   : > { %550 = vst.msk [vmem:[#allocation2 + $0x20] sm:$0xff] %vm286_vm0, %v533_v57  ;;  %v1047_v61 = vadd.f32 %v1046_v59, %v1045_v55  ;;  %v599_v62 = vadd.f32 %v583_v60, %v567_v56  ;;  %v577_v55 = vld [vmem:[%s1431_s15 + $0x60] sm:$0xff]  ;;  %v578_v60 = vld [vmem:[%s1431_s15 + $0x68] sm:$0xff] }
 0x105   : > { %v1048_v63 = vpop.f32.mrf.mxu0  ;;  %v593_v56 = vld [vmem:[#allocation2 + $0x60] sm:$0xff] }
 0x106   : > { %v534_v1 = vadd.f32 %v1047_v61, %v341_v58  ;;  %1109 = vmatprep.mubr.msk.f32.mxu1 %vm286_vm0, %v599_v62  ;;  %v609_v59 = vadd.f32 %v593_v56, %v577_v55  ;;  %v594_v61 = vld [vmem:[#allocation2 + $0x68] sm:$0xff]  ;;  %v579_v62 = vld [vmem:[%s1431_s15 + $0x70] sm:$0xff] }
 0x107   : > { %v1049_v3 = vpop.f32.mrf.mxu0  ;;  %v584_v4 = vld [vmem:[#allocation2 + $0x18] sm:$0xff] }
 0x108   : > { %551 = vst.msk [vmem:[#allocation2 + $0x28] sm:$0xff] %vm286_vm0, %v534_v1  ;;  %v1050_v5 = vadd.f32 %v1049_v3, %v1048_v63  ;;  %v600_v6 = vadd.f32 %v584_v4, %v568_v0  ;;  %v595_v63 = vld [vmem:[#allocation2 + $0x70] sm:$0xff]  ;;  %v610_v0 = vadd.f32 %v594_v61, %v578_v60 }
 0x109   : > { %v1051_v7 = vpop.f32.mrf.mxu0  ;;  %v611_v1 = vadd.f32 %v595_v63, %v579_v62  ;;  %v596_v3 = vld [vmem:[#allocation2 + $0x78] sm:$0xff] }
 0x10a   : > { %v535_v9 = vadd.f32 %v1050_v5, %v342_v2  ;;  %1110 = vmatmul.mubr.msk.f32.gmra.mxu1 %vm286_vm0, %v600_v6  ;;  %v580_v2 = vld [vmem:[%s1431_s15 + $0x78] sm:$0xff]  ;;  %v1483_v5 = vld [vmem:[%s1553_s4] ss:$0 sm:$0xff] }
 0x10b   : > { %v1052_v11 = vpop.f32.mrf.mxu0  ;;  %v585_v12 = vld [vmem:[#allocation2 + $0x20] sm:$0xff]  ;;  %v612_v4 = vadd.f32 %v596_v3, %v580_v2 }
 0x10c   : > { %552 = vst.msk [vmem:[#allocation2 + $0x30] sm:$0xff] %vm286_vm0, %v535_v9  ;;  %v1053_v13 = vadd.f32 %v1052_v11, %v1051_v7  ;;  %v601_v14 = vadd.f32 %v585_v12, %v569_v8 }
 0x10d   : > { %v1054_v15 = vpop.f32.mrf.mxu0 }
 0x10e   : > { %v536_v17 = vadd.f32 %v1053_v13, %v343_v10  ;;  %1112 = vmatprep.mubr.msk.f32.mxu1 %vm286_vm0, %v601_v14 }
 0x10f   : > { %v1055_v19 = vpop.f32.mrf.mxu0  ;;  %v586_v20 = vld [vmem:[#allocation2 + $0x28] sm:$0xff] }
 0x110   : > { %553 = vst.msk [vmem:[#allocation2 + $0x38] sm:$0xff] %vm286_vm0, %v536_v17  ;;  %v1056_v21 = vadd.f32 %v1055_v19, %v1054_v15  ;;  %v602_v22 = vadd.f32 %v586_v20, %v570_v16 }
 0x111   : > { %v1057_v23 = vpop.f32.mrf.mxu0 }
 0x112   : > { %v537_v25 = vadd.f32 %v1056_v21, %v344_v18  ;;  %1113 = vmatmul.mubr.msk.f32.gmra.mxu1 %vm286_vm0, %v602_v22 }
 0x113   : > { %v1058_v27 = vpop.f32.mrf.mxu0  ;;  %v587_v28 = vld [vmem:[#allocation2 + $0x30] sm:$0xff] }
 0x114   : > { %554 = vst.msk [vmem:[#allocation2 + $0x40] sm:$0xff] %vm286_vm0, %v537_v25  ;;  %v1059_v29 = vadd.f32 %v1058_v27, %v1057_v23  ;;  %v603_v30 = vadd.f32 %v587_v28, %v571_v24 }
 0x115   : > { %v1060_v31 = vpop.f32.mrf.mxu0 }
 0x116   : > { %v538_v33 = vadd.f32 %v1059_v29, %v345_v26  ;;  %1115 = vmatprep.mubr.msk.f32.mxu1 %vm286_vm0, %v603_v30 }
 0x117   : > { %v1061_v35 = vpop.f32.mrf.mxu0  ;;  %v588_v36 = vld [vmem:[#allocation2 + $0x38] sm:$0xff] }
 0x118   : > { %555 = vst.msk [vmem:[#allocation2 + $0x48] sm:$0xff] %vm286_vm0, %v538_v33  ;;  %v1062_v37 = vadd.f32 %v1061_v35, %v1060_v31  ;;  %v604_v38 = vadd.f32 %v588_v36, %v572_v32 }
 0x119   : > { %v1063_v39 = vpop.f32.mrf.mxu0 }
 0x11a   : > { %v539_v41 = vadd.f32 %v1062_v37, %v346_v34  ;;  %1116 = vmatmul.mubr.msk.f32.gmra.mxu1 %vm286_vm0, %v604_v38 }
 0x11b   : > { %v1064_v43 = vpop.f32.mrf.mxu0  ;;  %v589_v44 = vld [vmem:[#allocation2 + $0x40] sm:$0xff] }
 0x11c   : > { %556 = vst.msk [vmem:[#allocation2 + $0x50] sm:$0xff] %vm286_vm0, %v539_v41  ;;  %v1065_v45 = vadd.f32 %v1064_v43, %v1063_v39  ;;  %v605_v46 = vadd.f32 %v589_v44, %v573_v40 }
 0x11e   : > { %v540_v48 = vadd.f32 %v1065_v45, %v347_v42  ;;  %1118 = vmatprep.mubr.msk.f32.mxu1 %vm286_vm0, %v605_v46 }
 0x11f   : > { %v590_v49 = vld [vmem:[#allocation2 + $0x48] sm:$0xff] }
 0x120   : > { %557 = vst.msk [vmem:[#allocation2 + $0x58] sm:$0xff] %vm286_vm0, %v540_v48  ;;  %v606_v50 = vadd.f32 %v590_v49, %v574_v47 }
 0x122   : > { %1119 = vmatmul.mubr.msk.f32.gmra.mxu1 %vm286_vm0, %v606_v50 }
 0x123   : > { %v591_v52 = vld [vmem:[#allocation2 + $0x50] sm:$0xff] }
 0x124   : > { %v607_v53 = vadd.f32 %v591_v52, %v575_v51 }
 0x126   : > { %1121 = vmatprep.mubr.msk.f32.mxu1 %vm286_vm0, %v607_v53 }
 0x127   : > { %v592_v57 = vld [vmem:[#allocation2 + $0x58] sm:$0xff] }
 0x128   : > { %v608_v58 = vadd.f32 %v592_v57, %v576_v54 }
 0x12a   : > { %1122 = vmatmul.mubr.msk.f32.gmra.mxu1 %vm286_vm0, %v608_v58 }
 0x12b   : > { %1124 = vmatprep.mubr.msk.f32.mxu1 %vm286_vm0, %v609_v59 }
 0x12e   : > { %1125 = vmatmul.mubr.msk.f32.gmra.mxu1 %vm286_vm0, %v610_v0 }
 0x12f   : > { %1127 = vmatprep.mubr.msk.f32.mxu1 %vm286_vm0, %v611_v1 }
 0x132   : > { %1128 = vmatmul.mubr.msk.f32.gmra.mxu1 %vm286_vm0, %v612_v4 }
 0x1c2   : > { %v1108_v6 = vpop.f32.mrf.mxu1 }
 0x1c3   : > { %v744_v7 = vadd.f32 %v1108_v6, %v1483_v5 }
 0x1c4   : > { %v738_v8 = vpop.f32.mrf.mxu1 }
 0x1c5   : > { %vm818_vm1 = vcmp.ge.f32.partialorder %v744_v7, 0.0  ;;  %v834_v9 = vmul.f32 0.01, %v744_v7  ;;  %v739_v10 = vadd.f32 %v1483_v5, %v738_v8 }
 0x1c7   : > { %v850_v11 = vsel %vm818_vm1, %v744_v7, %v834_v9  ;;  %vm817_vm2 = vcmp.ge.f32.partialorder %v739_v10, 0.0  ;;  %v833_v12 = vmul.f32 0.01, %v739_v10 }
 0x1c8   : > { %866 = vst.msk [vmem:[%s1491_s23 + $0x8] sm:$0xff] %vm286_vm0, %v850_v11 }
 0x1c9   : > { %v849_v13 = vsel %vm817_vm2, %v739_v10, %v833_v12 }
 0x1ca   : > { %865 = vst.msk [vmem:[%s1491_s23] sm:$0xff] %vm286_vm0, %v849_v13  ;;  %v1111_v14 = vpop.f32.mrf.mxu1 }
 0x1cb   : > { %v754_v15 = vadd.f32 %v1111_v14, %v1483_v5 }
 0x1cc   : > { %v748_v16 = vpop.f32.mrf.mxu1 }
 0x1cd   : > { %vm820_vm3 = vcmp.ge.f32.partialorder %v754_v15, 0.0  ;;  %v836_v17 = vmul.f32 0.01, %v754_v15  ;;  %v749_v18 = vadd.f32 %v1483_v5, %v748_v16 }
 0x1cf   : > { %v852_v19 = vsel %vm820_vm3, %v754_v15, %v836_v17  ;;  %vm819_vm4 = vcmp.ge.f32.partialorder %v749_v18, 0.0  ;;  %v835_v20 = vmul.f32 0.01, %v749_v18 }
 0x1d0   : > { %868 = vst.msk [vmem:[%s1491_s23 + $0x18] sm:$0xff] %vm286_vm0, %v852_v19 }
 0x1d1   : > { %v851_v21 = vsel %vm819_vm4, %v749_v18, %v835_v20 }
 0x1d2   : > { %867 = vst.msk [vmem:[%s1491_s23 + $0x10] sm:$0xff] %vm286_vm0, %v851_v21  ;;  %v1114_v22 = vpop.f32.mrf.mxu1 }
 0x1d3   : > { %v764_v23 = vadd.f32 %v1114_v22, %v1483_v5 }
 0x1d4   : > { %v758_v24 = vpop.f32.mrf.mxu1 }
 0x1d5   : > { %vm822_vm5 = vcmp.ge.f32.partialorder %v764_v23, 0.0  ;;  %v838_v25 = vmul.f32 0.01, %v764_v23  ;;  %v759_v26 = vadd.f32 %v1483_v5, %v758_v24 }
 0x1d7   : > { %v854_v27 = vsel %vm822_vm5, %v764_v23, %v838_v25  ;;  %vm821_vm6 = vcmp.ge.f32.partialorder %v759_v26, 0.0  ;;  %v837_v28 = vmul.f32 0.01, %v759_v26 }
 0x1d8   : > { %870 = vst.msk [vmem:[%s1491_s23 + $0x28] sm:$0xff] %vm286_vm0, %v854_v27 }
 0x1d9   : > { %v853_v29 = vsel %vm821_vm6, %v759_v26, %v837_v28 }
 0x1da   : > { %869 = vst.msk [vmem:[%s1491_s23 + $0x20] sm:$0xff] %vm286_vm0, %v853_v29  ;;  %v1117_v30 = vpop.f32.mrf.mxu1 }
 0x1db   : > { %v774_v31 = vadd.f32 %v1117_v30, %v1483_v5 }
 0x1dc   : > { %v768_v32 = vpop.f32.mrf.mxu1 }
 0x1dd   : > { %vm824_vm7 = vcmp.ge.f32.partialorder %v774_v31, 0.0  ;;  %v840_v33 = vmul.f32 0.01, %v774_v31  ;;  %v769_v34 = vadd.f32 %v1483_v5, %v768_v32 }
 0x1df   : > { %v856_v35 = vsel %vm824_vm7, %v774_v31, %v840_v33  ;;  %vm823_vm8 = vcmp.ge.f32.partialorder %v769_v34, 0.0  ;;  %v839_v36 = vmul.f32 0.01, %v769_v34 }
 0x1e0   : > { %872 = vst.msk [vmem:[%s1491_s23 + $0x38] sm:$0xff] %vm286_vm0, %v856_v35 }
 0x1e1   : > { %v855_v37 = vsel %vm823_vm8, %v769_v34, %v839_v36 }
 0x1e2   : > { %871 = vst.msk [vmem:[%s1491_s23 + $0x30] sm:$0xff] %vm286_vm0, %v855_v37  ;;  %v1120_v38 = vpop.f32.mrf.mxu1 }
 0x1e3   : > { %v784_v39 = vadd.f32 %v1120_v38, %v1483_v5 }
 0x1e4   : > { %v778_v40 = vpop.f32.mrf.mxu1 }
 0x1e5   : > { %vm826_vm9 = vcmp.ge.f32.partialorder %v784_v39, 0.0  ;;  %v842_v41 = vmul.f32 0.01, %v784_v39  ;;  %v779_v42 = vadd.f32 %v1483_v5, %v778_v40 }
 0x1e7   : > { %v858_v43 = vsel %vm826_vm9, %v784_v39, %v842_v41  ;;  %vm825_vm10 = vcmp.ge.f32.partialorder %v779_v42, 0.0  ;;  %v841_v44 = vmul.f32 0.01, %v779_v42 }
 0x1e8   : > { %874 = vst.msk [vmem:[%s1491_s23 + $0x48] sm:$0xff] %vm286_vm0, %v858_v43 }
 0x1e9   : > { %v857_v45 = vsel %vm825_vm10, %v779_v42, %v841_v44 }
 0x1ea   : > { %873 = vst.msk [vmem:[%s1491_s23 + $0x40] sm:$0xff] %vm286_vm0, %v857_v45  ;;  %v1123_v46 = vpop.f32.mrf.mxu1 }
 0x1eb   : > { %v794_v47 = vadd.f32 %v1123_v46, %v1483_v5 }
 0x1ec   : > { %v788_v48 = vpop.f32.mrf.mxu1 }
 0x1ed   : > { %vm828_vm11 = vcmp.ge.f32.partialorder %v794_v47, 0.0  ;;  %v844_v49 = vmul.f32 0.01, %v794_v47  ;;  %v789_v50 = vadd.f32 %v1483_v5, %v788_v48 }
 0x1ee   : > { %v1126_v51 = vpop.f32.mrf.mxu1 }
 0x1ef   : > { %v860_v52 = vsel %vm828_vm11, %v794_v47, %v844_v49  ;;  %vm827_vm12 = vcmp.ge.f32.partialorder %v789_v50, 0.0  ;;  %v843_v53 = vmul.f32 0.01, %v789_v50  ;;  %v804_v54 = vadd.f32 %v1126_v51, %v1483_v5 }
 0x1f0   : > { %876 = vst.msk [vmem:[%s1491_s23 + $0x58] sm:$0xff] %vm286_vm0, %v860_v52  ;;  %v798_v55 = vpop.f32.mrf.mxu1 }
 0x1f1   : > { %v859_v56 = vsel %vm827_vm12, %v789_v50, %v843_v53  ;;  %vm830_vm13 = vcmp.ge.f32.partialorder %v804_v54, 0.0  ;;  %v846_v57 = vmul.f32 0.01, %v804_v54  ;;  %v799_v58 = vadd.f32 %v1483_v5, %v798_v55 }
 0x1f2   : > { %875 = vst.msk [vmem:[%s1491_s23 + $0x50] sm:$0xff] %vm286_vm0, %v859_v56  ;;  %v1129_v59 = vpop.f32.mrf.mxu1 }
 0x1f3   : > { %v862_v60 = vsel %vm830_vm13, %v804_v54, %v846_v57  ;;  %vm829_vm14 = vcmp.ge.f32.partialorder %v799_v58, 0.0  ;;  %v845_v61 = vmul.f32 0.01, %v799_v58  ;;  %v814_v62 = vadd.f32 %v1129_v59, %v1483_v5 }
 0x1f4   : > { %878 = vst.msk [vmem:[%s1491_s23 + $0x68] sm:$0xff] %vm286_vm0, %v862_v60  ;;  %v808_v63 = vpop.f32.mrf.mxu1 }
 0x1f5   : > { %v861_v0 = vsel %vm829_vm14, %v799_v58, %v845_v61  ;;  %vm832_vm15 = vcmp.ge.f32.partialorder %v814_v62, 0.0  ;;  %v848_v1 = vmul.f32 0.01, %v814_v62  ;;  %v809_v2 = vadd.f32 %v1483_v5, %v808_v63 }
 0x1f6   : > { %877 = vst.msk [vmem:[%s1491_s23 + $0x60] sm:$0xff] %vm286_vm0, %v861_v0 }
 0x1f7   : > { %v864_v3 = vsel %vm832_vm15, %v814_v62, %v848_v1  ;;  %vm831_vm1 = vcmp.ge.f32.partialorder %v809_v2, 0.0  ;;  %v847_v4 = vmul.f32 0.01, %v809_v2 }
 0x1f8   : > { %880 = vst.msk [vmem:[%s1491_s23 + $0x78] sm:$0xff] %vm286_vm0, %v864_v3 }
 0x1f9   : > { %v863_v6 = vsel %vm831_vm1, %v809_v2, %v847_v4 }
 0x1fa   : > { %879 = vst.msk [vmem:[%s1491_s23 + $0x70] sm:$0xff] %vm286_vm0, %v863_v6 }
 0x1fb PF: > { %s15_s20 = sadd.s32 1, %s1209_s20   ;;  %s1555_s18 = smov %s1205_s19 }
 0x1fc   : > { %p12_p5 = scmp.ge.s32.totalorder %s15_s20, 4   ;;  %s1556_s19 = smov %s1558_s21 }
 0x1fe   :  { %14 = sbr.rel (!%p12_p5) target bundleno = 2 (0x2), region = 82 }

</bundles_post_ra>
